<compile_context>
chip_gen: v7x
topology: tpu7x:2x2x1
jax: 0.10.0
libtpu: 0.0.40
codegen_flags: <defaults>
</compile_context>

<pallas_src>
import functools

import jax
import jax.numpy as jnp
from jax import lax
from jax.experimental import pallas as pl
from jax.experimental.pallas import tpu as pltpu


# ----------------------------------------------------------------------------
# Pallas kernel: fused [conv3x3 + BN(batch stats) + LeakyReLU(0.2)] x 2
# ----------------------------------------------------------------------------
def _fused_unet_block_kernel(x_ref, w1_ref, g1_ref, b1_ref, w2_ref, g2_ref,
                             b2_ref, t_ref, o_ref, xpad, *, W, C1, C2):
    # x_ref : (N, H, W*C1)   f32   lane-dense input rows (lane = w*C1 + cin)
    # w*_ref: (3, (W+2)*Cin, W*C2) bf16  banded conv weights (one slab per ky)
    # g*/b* : (1, W*C2)      f32   BN gamma / beta, pre-tiled onto lanes
    # t_ref : (W*C2, W*C2)   f32   group-mean matrix (avg over W groups, tiled back)
    # o_ref : (N*H, W*C2)    f32   lane-dense output (row=(n,h), lane = w*C2 + cout)
    # xpad  : (N, H+2, (W+2)*max(C1,C2)) bf16  shared halo scratch (both layers)
    N, H, _ = x_ref.shape
    NH = N * H
    Wp = W + 2
    eps = 1e-5
    slope = 0.2
    T = t_ref[...]

    def fill_halo(rows, c):
        # rows: (N, H, W*c) value -> zero-bordered (N, H+2, (W+2)*c) slab in xpad.
        wc = Wp * c
        zrow = jnp.zeros((N, 1, wc), xpad.dtype)
        zcol = jnp.zeros((N, H, c), xpad.dtype)
        xpad[:, 0:1, 0:wc] = zrow                       # top halo row
        xpad[:, H + 1:H + 2, 0:wc] = zrow               # bottom halo row
        # interior in ONE full-width store; left/right zero columns are
        # concatenated in-register (no full zero-fill of the buffer).
        xpad[:, 1:H + 1, 0:wc] = jnp.concatenate(
            [zcol, rows.astype(xpad.dtype), zcol], axis=2)

    def conv3x3_banded(w_ref, c):
        # One matmul per kernel row ky: (NH, (W+2)*c) x ((W+2)*c, W*C2).
        # Result is already lane-dense; conv bias omitted (cancels in batch-stat BN).
        wc = Wp * c
        acc = jnp.zeros((NH, W * C2), jnp.float32)
        for ky in range(3):                              # static unroll
            lhs = xpad[:, ky:ky + H, 0:wc].reshape(NH, wc)
            acc = acc + jnp.dot(lhs, w_ref[ky],
                                preferred_element_type=jnp.float32)
        return acc                                       # (NH, W*C2) f32

    def bn_lrelu(y, g_ref, b_ref):
        # BatchNorm2d training-mode forward, all elementwise math on the packed
        # (NH, W*C2) view.  y @ T averages each channel over its W lane-groups
        # and broadcasts it back (tiled), so stats stay lane-dense too.
        m_t = jnp.mean(jnp.dot(y, T, preferred_element_type=jnp.float32),
                       axis=0, keepdims=True)            # tiled per-channel mean
        cen = y - m_t
        v_t = jnp.mean(jnp.dot(cen * cen, T, preferred_element_type=jnp.float32),
                       axis=0, keepdims=True)            # two-pass biased variance
        out = cen * (g_ref[...] * lax.rsqrt(v_t + eps)) + b_ref[...]
        return jnp.where(out > 0, out, slope * out)      # LeakyReLU(0.2)

    # ---- layer 1 -------------------------------------------------------------
    fill_halo(x_ref[...], C1)                            # f32 -> bf16 cast here
    y1 = bn_lrelu(conv3x3_banded(w1_ref, C1), g1_ref, b1_ref)   # (NH, W*C2)

    # ---- layer 2 (reuses the same halo scratch; layer-1 slab is dead) --------
    fill_halo(y1.reshape(N, H, W * C2), C2)
    y2 = bn_lrelu(conv3x3_banded(w2_ref, C2), g2_ref, b2_ref)

    o_ref[...] = y2                                      # single full-lane store


# ----------------------------------------------------------------------------
# Wrapper: weight prep + pallas_call
# ----------------------------------------------------------------------------
def _banded_conv_weight(w, W):
    """(3,3,Cin,Cout) -> (3, (W+2)*Cin, W*Cout) bf16 banded (Toeplitz) weight.

    B[ky, p*Cin + cin, wout*Cout + cout] = w[ky, p - wout, cin, cout] for
    p - wout in {0,1,2}, else 0, where p indexes padded columns.
    """
    _, _, cin, cout = w.shape
    Wp = W + 2
    # sel[kx, wout, p] = 1.0 where p == wout + kx
    sel = (jnp.arange(Wp)[None, None, :] ==
           (jnp.arange(W)[None, :, None] + jnp.arange(3)[:, None, None]))
    b = jnp.einsum('xwp,yxco->ypcwo', sel.astype(w.dtype), w)
    return b.reshape(3, Wp * cin, W * cout).astype(jnp.bfloat16)


def _group_mean_matrix(W, C):
    """(W*C, W*C) f32: right-multiplying by this averages each channel over its
    W lane-groups and broadcasts the result back to every group."""
    i = jnp.arange(W * C)
    return ((i[:, None] % C) == (i[None, :] % C)).astype(jnp.float32) / W


def fused_conv_bn_lrelu_x2(x_nhwc, w1, g1, b1, w2, g2, b2):
    """x_nhwc: (N,H,W,C1) f32; w1: (3,3,C1,C2); w2: (3,3,C2,C2) -> (N,H,W,C2) f32."""
    N, H, W, C1 = x_nhwc.shape
    C2 = w1.shape[-1]

    x_rows = x_nhwc.reshape(N, H, W * C1)      # lane-dense input rows
    w1b = _banded_conv_weight(w1, W)
    w2b = _banded_conv_weight(w2, W)
    t = _group_mean_matrix(W, C2)

    def tile_lanes(v):                          # (C2,) -> (1, W*C2) lane-tiled
        return jnp.tile(v.reshape(1, C2).astype(jnp.float32), (1, W))

    out = pl.pallas_call(
        functools.partial(_fused_unet_block_kernel, W=W, C1=C1, C2=C2),
        out_shape=jax.ShapeDtypeStruct((N * H, W * C2), jnp.float32),
        in_specs=[pl.BlockSpec(memory_space=pltpu.MemorySpace.VMEM)] * 8,
        out_specs=pl.BlockSpec(memory_space=pltpu.MemorySpace.VMEM),
        scratch_shapes=[
            # one bf16 halo buffer, shared by both layers (peak = max, not sum)
            pltpu.VMEM((N, H + 2, (W + 2) * max(C1, C2)), jnp.bfloat16),
        ],
    )(x_rows, w1b, tile_lanes(g1), tile_lanes(b1),
      w2b, tile_lanes(g2), tile_lanes(b2), t)
    return out.reshape(N, H, W, C2)


# ----------------------------------------------------------------------------
# Plain-JAX glue: bilinear upsample (align_corners=True), pad, concat
# ----------------------------------------------------------------------------
def upsample_bilinear_align_corners_x2(x):
    """x: (N,C,H,W) -> (N,C,2H,2W); matches nn.Upsample(2,'bilinear',align_corners=True)."""
    N, C, H, W = x.shape
    Ho, Wo = 2 * H, 2 * W

    def coords(out_size, in_size):
        if out_size == 1 or in_size == 1:
            return jnp.zeros((out_size,), jnp.float32)
        return jnp.arange(out_size, dtype=jnp.float32) * (in_size - 1) / (out_size - 1)

    ys = coords(Ho, H)
    xs = coords(Wo, W)
    y0 = jnp.floor(ys).astype(jnp.int32)
    y1 = jnp.minimum(y0 + 1, H - 1)
    wy = (ys - y0.astype(jnp.float32))[None, None, :, None]
    x0 = jnp.floor(xs).astype(jnp.int32)
    x1 = jnp.minimum(x0 + 1, W - 1)
    wx = (xs - x0.astype(jnp.float32))[None, None, None, :]

    top = x[:, :, y0, :]
    bot = x[:, :, y1, :]
    row = top * (1.0 - wy) + bot * wy
    left = row[:, :, :, x0]
    right = row[:, :, :, x1]
    return left * (1.0 - wx) + right * wx


@functools.partial(jax.jit, static_argnames=("upsample",))
def unet_block_forward(params, x, skip=None, upsample=False):
    """x: NCHW float32. Mirrors UNetBlock.forward."""
    if upsample:
        x = upsample_bilinear_align_corners_x2(x)
        if skip is not None:
            diffY = skip.shape[2] - x.shape[2]
            diffX = skip.shape[3] - x.shape[3]
            x = jnp.pad(x, ((0, 0), (0, 0),
                            (diffY // 2, diffY - diffY // 2),
                            (diffX // 2, diffX - diffX // 2)))
            x = jnp.concatenate([x, skip], axis=1)
    # Single NCHW -> NHWC transpose at the boundary; both conv+BN+LReLU layers
    # run in ONE fused Pallas kernel (intermediate never leaves VMEM).
    # Conv biases params["b1"]/["b2"] are accepted for interface parity but not
    # applied: a per-channel constant before batch-stat BatchNorm cancels exactly.
    h = jnp.transpose(x, (0, 2, 3, 1))
    h = fused_conv_bn_lrelu_x2(h,
                               params["w1"], params["g1"], params["be1"],
                               params["w2"], params["g2"], params["be2"])
    return jnp.transpose(h, (0, 3, 1, 2))


def init_params(key, cin, cout):
    ks = jax.random.split(key, 4)
    return {
        "w1": jax.random.normal(ks[0], (3, 3, cin, cout), jnp.float32) / jnp.sqrt(9.0 * cin),
        "b1": jax.random.normal(ks[1], (cout,), jnp.float32) * 0.01,   # unused (cancels in BN)
        "g1": jnp.ones((cout,), jnp.float32),
        "be1": jnp.zeros((cout,), jnp.float32),
        "w2": jax.random.normal(ks[2], (3, 3, cout, cout), jnp.float32) / jnp.sqrt(9.0 * cout),
        "b2": jax.random.normal(ks[3], (cout,), jnp.float32) * 0.01,   # unused (cancels in BN)
        "g2": jnp.ones((cout,), jnp.float32),
        "be2": jnp.zeros((cout,), jnp.float32),
    }


if __name__ == "__main__":
    key = jax.random.PRNGKey(0)
    kx, ks, kx2, kp1, kp2 = jax.random.split(key, 5)

    # Block 1: UNetBlock(in_channels=4, out_channels=8, upsample=False)
    p1 = init_params(kp1, 4, 8)
    x = jax.random.normal(kx, (2, 4, 16, 16), jnp.float32)          # NCHW
    y1 = unet_block_forward(p1, x, upsample=False)

    # Block 2: UNetBlock(in_channels=12, out_channels=8, upsample=True) with skip
    # (upsampled x has 8 channels, skip has 4 -> conv1 in_channels = 12)
    p2 = init_params(kp2, 12, 8)
    x2 = jax.random.normal(kx2, (2, 8, 8, 8), jnp.float32)
    skip = jax.random.normal(ks, (2, 4, 16, 16), jnp.float32)
    y2 = unet_block_forward(p2, x2, skip=skip, upsample=True)

    jax.block_until_ready((y1, y2))
    assert y1.shape == (2, 8, 16, 16) and y1.dtype == jnp.float32
    assert y2.shape == (2, 8, 16, 16) and y2.dtype == jnp.float32
    assert bool(jnp.all(jnp.isfinite(y1))) and bool(jnp.all(jnp.isfinite(y2)))
    print("KERNEL_OK")
</pallas_src>

<mosaic_0001>
module attributes {stable_mosaic.version = 11 : i64} {
  func.func @_fused_unet_block_kernel(%arg0: memref<2x16x64xf32, #tpu.memory_space<vmem>>, %arg1: memref<3x72x128xbf16, #tpu.memory_space<vmem>>, %arg2: memref<1x128xf32, #tpu.memory_space<vmem>>, %arg3: memref<1x128xf32, #tpu.memory_space<vmem>>, %arg4: memref<3x144x128xbf16, #tpu.memory_space<vmem>>, %arg5: memref<1x128xf32, #tpu.memory_space<vmem>>, %arg6: memref<1x128xf32, #tpu.memory_space<vmem>>, %arg7: memref<128x128xf32, #tpu.memory_space<vmem>>, %arg8: memref<32x128xf32, #tpu.memory_space<vmem>>, %arg9: memref<2x18x144xbf16, #tpu.memory_space<vmem>>) attributes {dimension_semantics = [], scalar_prefetch = 0 : i64, scratch_operands = 1 : i64, tpu.core_type = #tpu.core_type<tc>} {
    %c0 = arith.constant 0 : index
    %c0_0 = arith.constant 0 : index
    %0 = vector.load %arg7[%c0, %c0_0] : memref<128x128xf32, #tpu.memory_space<vmem>>, vector<128x128xf32>
    %c0_1 = arith.constant 0 : index
    %c0_2 = arith.constant 0 : index
    %c0_3 = arith.constant 0 : index
    %1 = vector.load %arg0[%c0_1, %c0_2, %c0_3] : memref<2x16x64xf32, #tpu.memory_space<vmem>>, vector<2x16x64xf32>
    %cst = arith.constant 0.000000e+00 : bf16
    %2 = vector.broadcast %cst : bf16 to vector<2x1x72xbf16>
    %cst_4 = arith.constant 0.000000e+00 : bf16
    %3 = vector.broadcast %cst_4 : bf16 to vector<2x16x4xbf16>
    %c0_5 = arith.constant 0 : index
    %c0_6 = arith.constant 0 : index
    %c0_7 = arith.constant 0 : index
    %4 = vector.load %arg9[%c0_5, %c0_6, %c0_7] : memref<2x18x144xbf16, #tpu.memory_space<vmem>>, vector<2x1x72xbf16>
    tpu.vector_store %arg9[%c0_5, %c0_6, %c0_7], %2 {strides = array<i32>} : memref<2x18x144xbf16, #tpu.memory_space<vmem>>, vector<2x1x72xbf16>,
    %c0_8 = arith.constant 0 : index
    %c17 = arith.constant 17 : index
    %c0_9 = arith.constant 0 : index
    %5 = vector.load %arg9[%c0_8, %c17, %c0_9] : memref<2x18x144xbf16, #tpu.memory_space<vmem>>, vector<2x1x72xbf16>
    tpu.vector_store %arg9[%c0_8, %c17, %c0_9], %2 {strides = array<i32>} : memref<2x18x144xbf16, #tpu.memory_space<vmem>>, vector<2x1x72xbf16>,
    %6 = arith.truncf %1 : vector<2x16x64xf32> to vector<2x16x64xbf16>
    %7 = tpu.concatenate %3, %6, %3 in 2 : vector<2x16x4xbf16>, vector<2x16x64xbf16>, vector<2x16x4xbf16> -> vector<2x16x72xbf16>
    %c0_10 = arith.constant 0 : index
    %c1 = arith.constant 1 : index
    %c0_11 = arith.constant 0 : index
    %8 = vector.load %arg9[%c0_10, %c1, %c0_11] : memref<2x18x144xbf16, #tpu.memory_space<vmem>>, vector<2x16x72xbf16>
    tpu.vector_store %arg9[%c0_10, %c1, %c0_11], %7 {strides = array<i32>} : memref<2x18x144xbf16, #tpu.memory_space<vmem>>, vector<2x16x72xbf16>,
    %cst_12 = arith.constant 0.000000e+00 : f32
    %9 = vector.broadcast %cst_12 : f32 to vector<32x128xf32>
    %c0_13 = arith.constant 0 : index
    %c0_14 = arith.constant 0 : index
    %c0_15 = arith.constant 0 : index
    %10 = vector.load %arg9[%c0_13, %c0_14, %c0_15] : memref<2x18x144xbf16, #tpu.memory_space<vmem>>, vector<2x16x72xbf16>
    %11 = vector.shape_cast %10 : vector<2x16x72xbf16> to vector<32x72xbf16>
    %c0_16 = arith.constant 0 : index
    %c0_17 = arith.constant 0 : index
    %c0_18 = arith.constant 0 : index
    %12 = vector.load %arg1[%c0_16, %c0_17, %c0_18] : memref<3x72x128xbf16, #tpu.memory_space<vmem>>, vector<1x72x128xbf16>
    %13 = vector.shape_cast %12 : vector<1x72x128xbf16> to vector<72x128xbf16>
    %cst_19 = arith.constant dense<0.000000e+00> : vector<32x128xf32>
    %14 = tpu.matmul %11, %13, %cst_19 {dimension_numbers = #tpu.dot_dimension_numbers<[1], [0], [0], [1], [0, 0, 1, 1], [], []>} : vector<32x72xbf16>, vector<72x128xbf16>, vector<32x128xf32> -> vector<32x128xf32>
    %15 = arith.addf %9, %14 : vector<32x128xf32>
    %c0_20 = arith.constant 0 : index
    %c1_21 = arith.constant 1 : index
    %c0_22 = arith.constant 0 : index
    %16 = vector.load %arg9[%c0_20, %c1_21, %c0_22] : memref<2x18x144xbf16, #tpu.memory_space<vmem>>, vector<2x16x72xbf16>
    %17 = vector.shape_cast %16 : vector<2x16x72xbf16> to vector<32x72xbf16>
    %c1_23 = arith.constant 1 : index
    %c0_24 = arith.constant 0 : index
    %c0_25 = arith.constant 0 : index
    %18 = vector.load %arg1[%c1_23, %c0_24, %c0_25] : memref<3x72x128xbf16, #tpu.memory_space<vmem>>, vector<1x72x128xbf16>
    %19 = vector.shape_cast %18 : vector<1x72x128xbf16> to vector<72x128xbf16>
    %cst_26 = arith.constant dense<0.000000e+00> : vector<32x128xf32>
    %20 = tpu.matmul %17, %19, %cst_26 {dimension_numbers = #tpu.dot_dimension_numbers<[1], [0], [0], [1], [0, 0, 1, 1], [], []>} : vector<32x72xbf16>, vector<72x128xbf16>, vector<32x128xf32> -> vector<32x128xf32>
    %21 = arith.addf %15, %20 : vector<32x128xf32>
    %c0_27 = arith.constant 0 : index
    %c2 = arith.constant 2 : index
    %c0_28 = arith.constant 0 : index
    %22 = vector.load %arg9[%c0_27, %c2, %c0_28] : memref<2x18x144xbf16, #tpu.memory_space<vmem>>, vector<2x16x72xbf16>
    %23 = vector.shape_cast %22 : vector<2x16x72xbf16> to vector<32x72xbf16>
    %c2_29 = arith.constant 2 : index
    %c0_30 = arith.constant 0 : index
    %c0_31 = arith.constant 0 : index
    %24 = vector.load %arg1[%c2_29, %c0_30, %c0_31] : memref<3x72x128xbf16, #tpu.memory_space<vmem>>, vector<1x72x128xbf16>
    %25 = vector.shape_cast %24 : vector<1x72x128xbf16> to vector<72x128xbf16>
    %cst_32 = arith.constant dense<0.000000e+00> : vector<32x128xf32>
    %26 = tpu.matmul %23, %25, %cst_32 {dimension_numbers = #tpu.dot_dimension_numbers<[1], [0], [0], [1], [0, 0, 1, 1], [], []>} : vector<32x72xbf16>, vector<72x128xbf16>, vector<32x128xf32> -> vector<32x128xf32>
    %27 = arith.addf %21, %26 : vector<32x128xf32>
    %cst_33 = arith.constant dense<0.000000e+00> : vector<32x128xf32>
    %28 = tpu.matmul %27, %0, %cst_33 {dimension_numbers = #tpu.dot_dimension_numbers<[1], [0], [0], [1], [0, 0, 1, 1], [], []>} : vector<32x128xf32>, vector<128x128xf32>, vector<32x128xf32> -> vector<32x128xf32>
    %cst_34 = arith.constant dense<0.000000e+00> : vector<128xf32>
    %29 = vector.multi_reduction <add>, %28, %cst_34 [0] : vector<32x128xf32> to vector<128xf32>
    %30 = vector.shape_cast %29 : vector<128xf32> to vector<1x128xf32>
    %cst_35 = arith.constant 3.200000e+01 : f32
    %31 = vector.broadcast %cst_35 : f32 to vector<1x128xf32>
    %32 = arith.divf %30, %31 : vector<1x128xf32>
    %33 = vector.broadcast %32 : vector<1x128xf32> to vector<32x128xf32>
    %34 = arith.subf %27, %33 : vector<32x128xf32>
    %35 = arith.mulf %34, %34 : vector<32x128xf32>
    %cst_36 = arith.constant dense<0.000000e+00> : vector<32x128xf32>
    %36 = tpu.matmul %35, %0, %cst_36 {dimension_numbers = #tpu.dot_dimension_numbers<[1], [0], [0], [1], [0, 0, 1, 1], [], []>} : vector<32x128xf32>, vector<128x128xf32>, vector<32x128xf32> -> vector<32x128xf32>
    %cst_37 = arith.constant dense<0.000000e+00> : vector<128xf32>
    %37 = vector.multi_reduction <add>, %36, %cst_37 [0] : vector<32x128xf32> to vector<128xf32>
    %38 = vector.shape_cast %37 : vector<128xf32> to vector<1x128xf32>
    %cst_38 = arith.constant 3.200000e+01 : f32
    %39 = vector.broadcast %cst_38 : f32 to vector<1x128xf32>
    %40 = arith.divf %38, %39 : vector<1x128xf32>
    %c0_39 = arith.constant 0 : index
    %c0_40 = arith.constant 0 : index
    %41 = vector.load %arg2[%c0_39, %c0_40] : memref<1x128xf32, #tpu.memory_space<vmem>>, vector<1x128xf32>
    %cst_41 = arith.constant 9.99999974E-6 : f32
    %42 = vector.broadcast %cst_41 : f32 to vector<1x128xf32>
    %43 = arith.addf %40, %42 : vector<1x128xf32>
    %44 = math.rsqrt %43 : vector<1x128xf32>
    %45 = arith.mulf %41, %44 : vector<1x128xf32>
    %46 = vector.broadcast %45 : vector<1x128xf32> to vector<32x128xf32>
    %47 = arith.mulf %34, %46 : vector<32x128xf32>
    %c0_42 = arith.constant 0 : index
    %c0_43 = arith.constant 0 : index
    %48 = vector.load %arg3[%c0_42, %c0_43] : memref<1x128xf32, #tpu.memory_space<vmem>>, vector<1x128xf32>
    %49 = vector.broadcast %48 : vector<1x128xf32> to vector<32x128xf32>
    %50 = arith.addf %47, %49 : vector<32x128xf32>
    %cst_44 = arith.constant 0.000000e+00 : f32
    %51 = vector.broadcast %cst_44 : f32 to vector<32x128xf32>
    %52 = arith.cmpf ogt, %50, %51 : vector<32x128xf32>
    %cst_45 = arith.constant 2.000000e-01 : f32
    %53 = vector.broadcast %cst_45 : f32 to vector<32x128xf32>
    %54 = arith.mulf %53, %50 : vector<32x128xf32>
    %55 = arith.select %52, %50, %54 : vector<32x128xi1>, vector<32x128xf32>
    %56 = vector.shape_cast %55 : vector<32x128xf32> to vector<2x16x128xf32>
    %cst_46 = arith.constant 0.000000e+00 : bf16
    %57 = vector.broadcast %cst_46 : bf16 to vector<2x1x144xbf16>
    %cst_47 = arith.constant 0.000000e+00 : bf16
    %58 = vector.broadcast %cst_47 : bf16 to vector<2x16x8xbf16>
    %c0_48 = arith.constant 0 : index
    %c0_49 = arith.constant 0 : index
    %c0_50 = arith.constant 0 : index
    %59 = vector.load %arg9[%c0_48, %c0_49, %c0_50] : memref<2x18x144xbf16, #tpu.memory_space<vmem>>, vector<2x1x144xbf16>
    tpu.vector_store %arg9[%c0_48, %c0_49, %c0_50], %57 {strides = array<i32>} : memref<2x18x144xbf16, #tpu.memory_space<vmem>>, vector<2x1x144xbf16>,
    %c0_51 = arith.constant 0 : index
    %c17_52 = arith.constant 17 : index
    %c0_53 = arith.constant 0 : index
    %60 = vector.load %arg9[%c0_51, %c17_52, %c0_53] : memref<2x18x144xbf16, #tpu.memory_space<vmem>>, vector<2x1x144xbf16>
    tpu.vector_store %arg9[%c0_51, %c17_52, %c0_53], %57 {strides = array<i32>} : memref<2x18x144xbf16, #tpu.memory_space<vmem>>, vector<2x1x144xbf16>,
    %61 = arith.truncf %56 : vector<2x16x128xf32> to vector<2x16x128xbf16>
    %62 = tpu.concatenate %58, %61, %58 in 2 : vector<2x16x8xbf16>, vector<2x16x128xbf16>, vector<2x16x8xbf16> -> vector<2x16x144xbf16>
    %c0_54 = arith.constant 0 : index
    %c1_55 = arith.constant 1 : index
    %c0_56 = arith.constant 0 : index
    %63 = vector.load %arg9[%c0_54, %c1_55, %c0_56] : memref<2x18x144xbf16, #tpu.memory_space<vmem>>, vector<2x16x144xbf16>
    tpu.vector_store %arg9[%c0_54, %c1_55, %c0_56], %62 {strides = array<i32>} : memref<2x18x144xbf16, #tpu.memory_space<vmem>>, vector<2x16x144xbf16>,
    %cst_57 = arith.constant 0.000000e+00 : f32
    %64 = vector.broadcast %cst_57 : f32 to vector<32x128xf32>
    %c0_58 = arith.constant 0 : index
    %c0_59 = arith.constant 0 : index
    %c0_60 = arith.constant 0 : index
    %65 = vector.load %arg9[%c0_58, %c0_59, %c0_60] : memref<2x18x144xbf16, #tpu.memory_space<vmem>>, vector<2x16x144xbf16>
    %66 = vector.shape_cast %65 : vector<2x16x144xbf16> to vector<32x144xbf16>
    %c0_61 = arith.constant 0 : index
    %c0_62 = arith.constant 0 : index
    %c0_63 = arith.constant 0 : index
    %67 = vector.load %arg4[%c0_61, %c0_62, %c0_63] : memref<3x144x128xbf16, #tpu.memory_space<vmem>>, vector<1x144x128xbf16>
    %68 = vector.shape_cast %67 : vector<1x144x128xbf16> to vector<144x128xbf16>
    %cst_64 = arith.constant dense<0.000000e+00> : vector<32x128xf32>
    %69 = tpu.matmul %66, %68, %cst_64 {dimension_numbers = #tpu.dot_dimension_numbers<[1], [0], [0], [1], [0, 0, 1, 1], [], []>} : vector<32x144xbf16>, vector<144x128xbf16>, vector<32x128xf32> -> vector<32x128xf32>
    %70 = arith.addf %64, %69 : vector<32x128xf32>
    %c0_65 = arith.constant 0 : index
    %c1_66 = arith.constant 1 : index
    %c0_67 = arith.constant 0 : index
    %71 = vector.load %arg9[%c0_65, %c1_66, %c0_67] : memref<2x18x144xbf16, #tpu.memory_space<vmem>>, vector<2x16x144xbf16>
    %72 = vector.shape_cast %71 : vector<2x16x144xbf16> to vector<32x144xbf16>
    %c1_68 = arith.constant 1 : index
    %c0_69 = arith.constant 0 : index
    %c0_70 = arith.constant 0 : index
    %73 = vector.load %arg4[%c1_68, %c0_69, %c0_70] : memref<3x144x128xbf16, #tpu.memory_space<vmem>>, vector<1x144x128xbf16>
    %74 = vector.shape_cast %73 : vector<1x144x128xbf16> to vector<144x128xbf16>
    %cst_71 = arith.constant dense<0.000000e+00> : vector<32x128xf32>
    %75 = tpu.matmul %72, %74, %cst_71 {dimension_numbers = #tpu.dot_dimension_numbers<[1], [0], [0], [1], [0, 0, 1, 1], [], []>} : vector<32x144xbf16>, vector<144x128xbf16>, vector<32x128xf32> -> vector<32x128xf32>
    %76 = arith.addf %70, %75 : vector<32x128xf32>
    %c0_72 = arith.constant 0 : index
    %c2_73 = arith.constant 2 : index
    %c0_74 = arith.constant 0 : index
    %77 = vector.load %arg9[%c0_72, %c2_73, %c0_74] : memref<2x18x144xbf16, #tpu.memory_space<vmem>>, vector<2x16x144xbf16>
    %78 = vector.shape_cast %77 : vector<2x16x144xbf16> to vector<32x144xbf16>
    %c2_75 = arith.constant 2 : index
    %c0_76 = arith.constant 0 : index
    %c0_77 = arith.constant 0 : index
    %79 = vector.load %arg4[%c2_75, %c0_76, %c0_77] : memref<3x144x128xbf16, #tpu.memory_space<vmem>>, vector<1x144x128xbf16>
    %80 = vector.shape_cast %79 : vector<1x144x128xbf16> to vector<144x128xbf16>
    %cst_78 = arith.constant dense<0.000000e+00> : vector<32x128xf32>
    %81 = tpu.matmul %78, %80, %cst_78 {dimension_numbers = #tpu.dot_dimension_numbers<[1], [0], [0], [1], [0, 0, 1, 1], [], []>} : vector<32x144xbf16>, vector<144x128xbf16>, vector<32x128xf32> -> vector<32x128xf32>
    %82 = arith.addf %76, %81 : vector<32x128xf32>
    %cst_79 = arith.constant dense<0.000000e+00> : vector<32x128xf32>
    %83 = tpu.matmul %82, %0, %cst_79 {dimension_numbers = #tpu.dot_dimension_numbers<[1], [0], [0], [1], [0, 0, 1, 1], [], []>} : vector<32x128xf32>, vector<128x128xf32>, vector<32x128xf32> -> vector<32x128xf32>
    %cst_80 = arith.constant dense<0.000000e+00> : vector<128xf32>
    %84 = vector.multi_reduction <add>, %83, %cst_80 [0] : vector<32x128xf32> to vector<128xf32>
    %85 = vector.shape_cast %84 : vector<128xf32> to vector<1x128xf32>
    %cst_81 = arith.constant 3.200000e+01 : f32
    %86 = vector.broadcast %cst_81 : f32 to vector<1x128xf32>
    %87 = arith.divf %85, %86 : vector<1x128xf32>
    %88 = vector.broadcast %87 : vector<1x128xf32> to vector<32x128xf32>
    %89 = arith.subf %82, %88 : vector<32x128xf32>
    %90 = arith.mulf %89, %89 : vector<32x128xf32>
    %cst_82 = arith.constant dense<0.000000e+00> : vector<32x128xf32>
    %91 = tpu.matmul %90, %0, %cst_82 {dimension_numbers = #tpu.dot_dimension_numbers<[1], [0], [0], [1], [0, 0, 1, 1], [], []>} : vector<32x128xf32>, vector<128x128xf32>, vector<32x128xf32> -> vector<32x128xf32>
    %cst_83 = arith.constant dense<0.000000e+00> : vector<128xf32>
    %92 = vector.multi_reduction <add>, %91, %cst_83 [0] : vector<32x128xf32> to vector<128xf32>
    %93 = vector.shape_cast %92 : vector<128xf32> to vector<1x128xf32>
    %cst_84 = arith.constant 3.200000e+01 : f32
    %94 = vector.broadcast %cst_84 : f32 to vector<1x128xf32>
    %95 = arith.divf %93, %94 : vector<1x128xf32>
    %c0_85 = arith.constant 0 : index
    %c0_86 = arith.constant 0 : index
    %96 = vector.load %arg5[%c0_85, %c0_86] : memref<1x128xf32, #tpu.memory_space<vmem>>, vector<1x128xf32>
    %cst_87 = arith.constant 9.99999974E-6 : f32
    %97 = vector.broadcast %cst_87 : f32 to vector<1x128xf32>
    %98 = arith.addf %95, %97 : vector<1x128xf32>
    %99 = math.rsqrt %98 : vector<1x128xf32>
    %100 = arith.mulf %96, %99 : vector<1x128xf32>
    %101 = vector.broadcast %100 : vector<1x128xf32> to vector<32x128xf32>
    %102 = arith.mulf %89, %101 : vector<32x128xf32>
    %c0_88 = arith.constant 0 : index
    %c0_89 = arith.constant 0 : index
    %103 = vector.load %arg6[%c0_88, %c0_89] : memref<1x128xf32, #tpu.memory_space<vmem>>, vector<1x128xf32>
    %104 = vector.broadcast %103 : vector<1x128xf32> to vector<32x128xf32>
    %105 = arith.addf %102, %104 : vector<32x128xf32>
    %cst_90 = arith.constant 0.000000e+00 : f32
    %106 = vector.broadcast %cst_90 : f32 to vector<32x128xf32>
    %107 = arith.cmpf ogt, %105, %106 : vector<32x128xf32>
    %cst_91 = arith.constant 2.000000e-01 : f32
    %108 = vector.broadcast %cst_91 : f32 to vector<32x128xf32>
    %109 = arith.mulf %108, %105 : vector<32x128xf32>
    %110 = arith.select %107, %105, %109 : vector<32x128xi1>, vector<32x128xf32>
    %c0_92 = arith.constant 0 : index
    %c0_93 = arith.constant 0 : index
    %111 = vector.load %arg8[%c0_92, %c0_93] : memref<32x128xf32, #tpu.memory_space<vmem>>, vector<32x128xf32>
    tpu.vector_store %arg8[%c0_92, %c0_93], %110 {strides = array<i32>} : memref<32x128xf32, #tpu.memory_space<vmem>>, vector<32x128xf32>,
    return
  }
}

</mosaic_0001>

<bundles_post_ra>
// kernel: unet_block_forward.1
= control target key start
LH: loop header
LB: loop body
LE: loop exit
PB: predicated region body
PF: predicated region fallthrough
CT: control target
= control target key end

     0   :  { %vm50_vm0 = vcmask 581632   ;;  %vm51_vm1 = vsmask.f32 256  ;;  %v53_v0 = vld [vmem:[#allocation2] sm:$0x1]  ;;  %s2287_s13 = smov 4   ;;  %s2912_s0 = inlined_call_operand.vmem [shape: f32[2,16,64], index: 0, kind: input, shape index: {}]   ;;  %s2913_s1 = inlined_call_operand.vmem [shape: bf16[3,72,128], index: 1, kind: input, shape index: {}]   ;;  %s2914_s7 = inlined_call_operand.vmem [shape: f32[128,128], index: 7, kind: input, shape index: {}]   ;;  %s2915_s4 = inlined_call_operand.vmem [shape: bf16[3,144,128], index: 4, kind: input, shape index: {}]   ;;  %s2916_s2 = inlined_call_operand.vmem [shape: f32[1,128], index: 2, kind: input, shape index: {}]   ;;  %s2917_s3 = inlined_call_operand.vmem [shape: f32[1,128], index: 3, kind: input, shape index: {}]   ;;  %s2918_s5 = inlined_call_operand.vmem [shape: f32[1,128], index: 5, kind: input, shape index: {}]   ;;  %s2919_s6 = inlined_call_operand.vmem [shape: f32[1,128], index: 6, kind: input, shape index: {}]   ;;  %s2920_s8 = inlined_call_operand.vmem [shape: f32[32,128], index: 8, kind: output, shape index: {}]  }
   0x1   :  { %v46_v1 = vld [vmem:[%s2912_s0] sm:$0xff]  ;;  %v47_v2 = vld [vmem:[%s2912_s0 + $0x8] sm:$0xff]  ;;  %v48_v3 = vld [vmem:[%s2912_s0 + $0x10] sm:$0xff]  ;;  %vm59_vm2 = vsmask.f32 7938  ;;  %vm269_vm5 = vcmask 1043456  }
   0x2   :  { %v67_v4 = vpack.c.bf16 %v47_v2, %v46_v1  ;;  %v49_v5 = vld [vmem:[%s2912_s0 + $0x18] sm:$0xff]  ;;  %vm2348_vm3 = vmand %vm50_vm0, %vm51_vm1  ;;  %v61_v10 = vld [vmem:[#allocation2 + $0x10] sm:$0x1]  ;;  %vm75_vm6 = vcmask 31744   ;;  %vm81_vm7 = vcmask 556032   ;;  %vm136_vm9 = vcmask 584704  }
   0x3   :  { %v56_v7 = vld [vmem:[#allocation2 + $0x18] sm:$0x1]  ;;  %v54_v8 = vsel %vm2348_vm3, 0, %v53_v0  ;;  %vm60_vm4 = vmand %vm50_vm0, %vm59_vm2  ;;  %v64_v11 = vld [vmem:[#allocation2 + $0x28] sm:$0x1]  ;;  %v68_v12 = vpack.c.bf16 %v49_v5, %v48_v3  ;;  %vm781_vm12 = vcmask 1040384  }
   0x4   :  { %v57_v9 = vsel %vm2348_vm3, 0, %v56_v7  ;;  %71 = vrot.lane.b32.xlu0 %v67_v4, %s2287_s13  ;;  %55 = vst [vmem:[#allocation2] sm:$0x1] %v54_v8  ;;  %v62_v13 = vsel %vm60_vm4, 0, %v61_v10  ;;  %v65_v14 = vsel %vm60_vm4, 0, %v64_v11  ;;  %v2239_v15 = vld [vmem:[%s2913_s1] sm:$0xff]   ;;  %vm2415_vm11 = vmand %vm136_vm9, %vm59_vm2 }
   0x5   :  { %58 = vst [vmem:[#allocation2 + $0x18] sm:$0x1] %v57_v9  ;;  %63 = vst [vmem:[#allocation2 + $0x10] sm:$0x1] %v62_v13  ;;  %1901 = vmatprep.subr.bf16.mxu0 %v2239_v15  ;;  %v2240_v16 = vld [vmem:[%s2913_s1 + $0x8] sm:$0xff]   ;;  %v2241_v17 = vld [vmem:[%s2913_s1 + $0x10] sm:$0xff]  }
   0x6   :  { %66 = vst [vmem:[#allocation2 + $0x28] sm:$0x1] %v65_v14  ;;  %1902 = vmatpush3.bf16.msra.mxu0 %v2239_v15  ;;  %v2242_v18 = vld [vmem:[%s2913_s1 + $0x24] sm:$0xff]   ;;  %v2244_v19 = vld [vmem:[%s2913_s1 + $0x2c] sm:$0xff]   ;;  %v2243_v20 = vld [vmem:[%s2913_s1 + $0x18] sm:$0xff]   ;;  %vm783_vm13 = vcmask 126980  }
   0x7   :  { %1903 = vmatprep.subr.bf16.mxu0 %v2240_v16  ;;  %1887 = vmatprep.subr.bf16.mxu1 %v2242_v18  ;;  %v2247_v21 = vld [vmem:[%s2913_s1 + $0x34] sm:$0xff]   ;;  %v2245_v22 = vld [vmem:[%s2913_s1 + $0x20] ss:$0 sps:$4 sm:$0xff]   ;;  %v2389_v25 = vld [vmem:[%s2913_s1 + $0x48] sm:$0xff]   ;;  %vm94_vm8 = vsmask.f32 4368 }
   0x8   :  { %73 = vrot.lane.b32.xlu0 %v68_v12, %s2287_s13  ;;  %1888 = vmatpush3.bf16.msra.mxu1 %v2242_v18  ;;  %v2250_v23 = vld [vmem:[%s2913_s1 + $0x3c] sm:$0xff]   ;;  %v366_v24 = vsel %vm269_vm5, %v2245_v22, 0  ;;  %v2252_v26 = vld [vmem:[%s2913_s1 + $0x44] ss:$0 sps:$4 sm:$0xff]   ;;  %v31_v29 = vld [vmem:[%s2914_s7 + $0x8] sm:$0xff]  ;;  %s2289_s0 = smov 8  }
   0x9   :  { %1889 = vmatprep.subr.bf16.mxu1 %v2244_v19  ;;  %v271_v27 = vsel %vm269_vm5, %v2252_v26, 0  ;;  %v30_v28 = vld [vmem:[%s2914_s7] sm:$0xff]  ;;  %vm2408_vm10 = vmor %vm51_vm1, %vm94_vm8  ;;  %vm784_vm14 = vsmask.f32 4352  ;;  %vm794_vm4 = vsmask.f32 7954 }
   0xa   :  { %1904 = vmatpush3.bf16.msra.mxu0 %v2240_v16  ;;  %v2403_v30 = vpack.c.bf16 %v31_v29, %v30_v28  ;;  %vm782_vm15 = vmand %vm781_vm12, %vm51_vm1  ;;  %vm423_vm1 = vcmask 1042432   ;;  %v2254_v11 = vld [vmem:[%s2913_s1 + $0x60] sm:$0xff]  }
   0xb   :  { %1905 = vmatprep.subr.bf16.mxu0 %v2241_v17  ;;  %v138_v47 = vld [vmem:[#allocation2] sm:$0xf]  ;;  %vm785_vm0 = vmand %vm783_vm13, %vm784_vm14  ;;  %vm168_vm14 = vsmask.f32 3328 }
   0xc   :  { %1890 = vmatpush3.bf16.msra.mxu1 %v2244_v19  ;;  %v143_v48 = vld [vmem:[#allocation2 + $0x10] sm:$0x1]  ;;  %v146_v0 = vld [vmem:[#allocation2 + $0x18] sm:$0xf]  ;;  %vm2442_vm8 = vmand %vm781_vm12, %vm59_vm2  ;;  %vm169_vm12 = vsmask.f32 7440 }
   0xd   :  { %1891 = vmatprep.subr.bf16.mxu1 %v2247_v21  ;;  %v150_v1 = vld [vmem:[#allocation2 + $0x28] sm:$0x1] }
   0xe   :  { %1906 = vmatpush3.bf16.msra.mxu0 %v2241_v17  ;;  %v2279_v17 = vld [vmem:[%s2915_s4 + $0xb8] sm:$0xff]  }
   0xf   :  { %1907 = vmatprep.subr.bf16.mxu0 %v2243_v20 }
  0x10   :  { %1892 = vmatpush3.bf16.msra.mxu1 %v2247_v21 }
  0x11   :  { %1893 = vmatprep.subr.bf16.mxu1 %v2250_v23 }
  0x12   :  { %1908 = vmatpush3.bf16.msra.mxu0 %v2243_v20 }
  0x13   :  { %2234 = vmatprep.subr.msk.bf16.mxu0 %vm269_vm5, %v2245_v22 }
  0x14   :  { %1894 = vmatpush3.bf16.msra.mxu1 %v2250_v23 }
  0x15   :  { %2233 = vmatprep.subr.msk.bf16.mxu1 %vm269_vm5, %v2252_v26 }
  0x16   :  { %1910 = vmatpush3.bf16.msra.mxu0 %v366_v24 }
  0x17   :  { %1915 = vmatprep.subr.bf16.mxu0 %v2389_v25 }
  0x18   :  { %1896 = vmatpush3.bf16.msra.mxu1 %v271_v27 }
  0x19   :  { %2082 = vmatprep.subr.bf16.mxu1 %v2403_v30 }
  0x76   :  { %v72_v31 = vpop.permute.xlu0 %71 }
  0x77   :  { %v78_v32 = vsel %vm75_vm6, 0, %v72_v31 }
  0x78   :  { %v82_v33 = vsel %vm81_vm7, %v78_v32, 0 }
  0x79   :  { %v1646_v34 = vcombine.low %v82_v33, %v82_v33  ;;  %v1647_v35 = vcombine.high %v82_v33, %v82_v33 }
  0x7a   :  { %v74_v36 = vpop.permute.xlu0 %73 }
  0x7b   :  { %v97_v37 = vshrl.u32 %v1646_v34, 16  ;;  %v105_v38 = vshrl.u32 %v1647_v35, 16  ;;  %v100_v39 = vshll.u32 %v1646_v34, 16  ;;  %v80_v40 = vsel %vm75_vm6, 0, %v74_v36  ;;  %vm2435_vm6 = vmor %vm785_vm0, %vm782_vm15 }
  0x7c   :  { %v108_v44 = vshll.u32 %v1647_v35, 16  ;;  %v83_v45 = vsel %vm81_vm7, %v80_v40, 0  ;;  %vm424_vm7 = vcmask 1046532   ;;  %vm2482_vm15 = vmor %vm168_vm14, %vm169_vm12  ;;  %vm876_vm14 = vcmask 130052  }
  0x7d   :  { %v99_v42 = vrot.slane %v97_v37, 7  ;;  %v107_v43 = vrot.slane %v105_v38, 7  ;;  %v1648_v49 = vcombine.low %v83_v45, %v83_v45  ;;  %v1649_v50 = vcombine.high %v83_v45, %v83_v45  ;;  %vm2702_vm12 = vmand %vm876_vm14, %vm794_vm4 }
  0x7f   :  { %v102_v51 = vor.u32 %v100_v39, %v99_v42  ;;  %v103_v52 = vrot.slane %v99_v42, 4  ;;  %v110_v53 = vor.u32 %v108_v44, %v107_v43  ;;  %v112_v54 = vrot.slane %v107_v43, 4  ;;  %v2251_v44 = vld [vmem:[%s2913_s1 + $0x50] sm:$0xff]  }
  0x80   :  { %v114_v55 = vshrl.u32 %v1648_v49, 16  ;;  %v122_v56 = vshrl.u32 %v1649_v50, 16  ;;  %v117_v61 = vshll.u32 %v1648_v49, 16  ;;  %v125_v63 = vshll.u32 %v1649_v50, 16 }
  0x81   :  { %v111_v57 = vsel %vm2408_vm10, %v103_v52, %v110_v53  ;;  %v139_v58 = vsel %vm2415_vm11, %v102_v51, %v138_v47  ;;  %v144_v59 = vsel %vm2348_vm3, %v112_v54, %v143_v48  ;;  %v2267_v48 = vld [vmem:[%s2915_s4 + $0x10] sm:$0xff]  }
  0x82   :  { %140 = vst [vmem:[#allocation2] sm:$0xf] %v139_v58  ;;  %142 = vst.msk [vmem:[#allocation2 + $0x8] sm:$0xf] %vm136_vm9, %v111_v57  ;;  %v116_v60 = vrot.slane %v114_v55, 7  ;;  %v124_v62 = vrot.slane %v122_v56, 7 }
  0x83   :  { %145 = vst [vmem:[#allocation2 + $0x10] sm:$0x1] %v144_v59 }
  0x84   :  { %v119_v2 = vor.u32 %v117_v61, %v116_v60  ;;  %v120_v3 = vrot.slane %v116_v60, 4  ;;  %v127_v4 = vor.u32 %v125_v63, %v124_v62  ;;  %v129_v5 = vrot.slane %v124_v62, 4 }
  0x86   :  { %v128_v7 = vsel %vm2408_vm10, %v120_v3, %v127_v4  ;;  %v147_v8 = vsel %vm2415_vm11, %v119_v2, %v146_v0  ;;  %v151_v9 = vsel %vm2348_vm3, %v129_v5, %v150_v1  ;;  %vm262_vm11 = vcmask 588800   ;;  %vm2448_vm3 = vmand %vm783_vm13, %vm794_vm4  ;;  %v2253_v1 = vld [vmem:[%s2913_s1 + $0x58] sm:$0xff]  }
  0x87   :  { %148 = vst [vmem:[#allocation2 + $0x18] sm:$0xf] %v147_v8  ;;  %149 = vst.msk [vmem:[#allocation2 + $0x20] sm:$0xf] %vm136_vm9, %v128_v7 }
  0x88   :  { %152 = vst [vmem:[#allocation2 + $0x28] sm:$0x1] %v151_v9  ;;  %vm2452_vm9 = vmor %vm423_vm1, %vm424_vm7 }
  0x89   :  { %v153_v12 = vld [vmem:[#allocation2] sm:$0xf]  ;;  %v154_v13 = vld [vmem:[#allocation2 + $0x8] sm:$0xf]  ;;  %vm796_vm13 = vmor %vm2448_vm3, %vm2442_vm8 }
  0x8a   :  { %v166_v14 = vld [vmem:[#allocation2 + $0x10] sm:$0x1]  ;;  %v1668_v15 = vcombine.low %v153_v12, %v154_v13  ;;  %v417_v16 = vld [vmem:[#allocation2] sm:$0xe]  ;;  %v428_v18 = vrot.slane %v154_v13, 5  ;;  %v172_v19 = vshrl.u32 %v153_v12, 16  ;;  %vm2696_vm3 = vmand %vm269_vm5, %vm59_vm2 }
  0x8b   :  { %v1677_v20 = vrot.slane %v417_v16, 9  ;;  %v175_v21 = vshll.u32 %v153_v12, 16  ;;  %v181_v22 = vshll.u32 %v154_v13, 16  ;;  %v185_v23 = vshrl.u32 %v154_v13, 16  ;;  %v787_v24 = vld [vmem:[#allocation2] sm:$0x11]  ;;  %vm878_vm2 = vmor %vm2702_vm12, %vm2696_vm3 }
  0x8c   :  { %1911 = vmatprep.mubr.msk.bf16.mxu0 %vm262_vm11, %v1668_v15  ;;  %v430_v26 = vrot.slane %v428_v18, 4  ;;  %v431_v27 = vrot.slane %v166_v14, 5  ;;  %v174_v28 = vrot.slane %v172_v19, 4  ;;  %v788_v29 = vsel %vm2435_vm6, 0, %v787_v24  ;;  %v797_v31 = vld [vmem:[#allocation2 + $0x10] sm:$0x11]  ;;  %vm2712_vm4 = vmor %vm876_vm14, %vm269_vm5 }
  0x8d   :  { %v177_v32 = vrot.slane %v175_v21, 5  ;;  %v183_v33 = vrot.slane %v181_v22, 5  ;;  %v187_v34 = vrot.slane %v185_v23, 4  ;;  %v191_v35 = vshll.u32 %v166_v14, 16  ;;  %789 = vst [vmem:[#allocation2] sm:$0x11] %v788_v29 }
  0x8e   :  { %v155_v36 = vld [vmem:[#allocation2 + $0x18] sm:$0xf]  ;;  %v2463_v37 = vld [vmem:[#allocation2 + $0x20] sm:$0xf]  ;;  %v429_v38 = vsel %vm2452_vm9, %v1677_v20, %v428_v18  ;;  %v432_v39 = vsel %vm2452_vm9, %v430_v26, %v431_v27  ;;  %v798_v40 = vsel %vm796_vm13, 0, %v797_v31  ;;  %v32_v12 = vld [vmem:[%s2914_s7 + $0x10] sm:$0xff] }
  0x8f   :  { %v1669_v42 = vcombine.low %v155_v36, %v2463_v37  ;;  %v1688_v43 = vcombine.low %v429_v38, %v432_v39  ;;  %v178_v45 = vor.u32 %v177_v32, %v174_v28  ;;  %v188_v46 = vor.u32 %v187_v34, %v183_v33  ;;  %v2478_v47 = vld [vmem:[#allocation2 + $0x28] sm:$0x1]  ;;  %799 = vst [vmem:[#allocation2 + $0x10] sm:$0x11] %v798_v40  ;;  %v790_v57 = vld [vmem:[#allocation2 + $0x18] sm:$0x11] }
  0x90   :  { %v196_v49 = vshrl.u32 %v155_v36, 16  ;;  %v199_v50 = vshll.u32 %v155_v36, 16  ;;  %v205_v51 = vshll.u32 %v2463_v37, 16  ;;  %v209_v52 = vshrl.u32 %v2463_v37, 16  ;;  %v800_v62 = vld [vmem:[#allocation2 + $0x28] sm:$0x11] }
  0x91   :  { %1912 = vmatmul.mubr.msk.bf16.vlgmr.msra.gmra.mrb[0].mxu0 %vm262_vm11, %v1669_v42  ;;  %v179_v53 = vrot.slane %v178_v45, 4  ;;  %v189_v54 = vrot.slane %v188_v46, 4  ;;  %v193_v55 = vrot.slane %v191_v35, 5  ;;  %v215_v56 = vshll.u32 %v2478_v47, 16  ;;  %v33_v13 = vld [vmem:[%s2914_s7 + $0x18] sm:$0xff]  ;;  %v34_v19 = vld [vmem:[%s2914_s7 + $0x20] sm:$0xff] }
  0x92   :  { %1916 = vmatpush3.bf16.msra.mxu0 %v2389_v25  ;;  %1925 = vmatprep.mubr.msk.bf16.mxu0 %vm262_vm11, %v1688_v43  ;;  %v198_v58 = vrot.slane %v196_v49, 4  ;;  %v201_v59 = vrot.slane %v199_v50, 5  ;;  %v207_v60 = vrot.slane %v205_v51, 5  ;;  %v211_v61 = vrot.slane %v209_v52, 4  ;;  %v35_v20 = vld [vmem:[%s2914_s7 + $0x28] sm:$0xff]  ;;  %v36_v28 = vld [vmem:[%s2914_s7 + $0x30] sm:$0xff] }
  0x93   :  { %1917 = vmatprep.subr.bf16.mxu0 %v2251_v44  ;;  %v184_v63 = vsel %vm2482_vm15, %v179_v53, %v183_v33  ;;  %v194_v0 = vsel %vm2482_vm15, %v189_v54, %v193_v55  ;;  %v791_v4 = vsel %vm2435_vm6, 0, %v790_v57  ;;  %v801_v5 = vsel %vm796_vm13, 0, %v800_v62  ;;  %v2255_v21 = vld [vmem:[%s2913_s1 + $0x68] ss:$0 sps:$4 sm:$0xff]   ;;  %v418_v22 = vld [vmem:[#allocation2 + $0x18] sm:$0xe] }
  0x94   :  { %v1659_v2 = vcombine.low %v184_v63, %v194_v0  ;;  %v202_v25 = vor.u32 %v201_v59, %v198_v58  ;;  %v212_v3 = vor.u32 %v211_v61, %v207_v60  ;;  %v217_v9 = vrot.slane %v215_v56, 5  ;;  %792 = vst [vmem:[#allocation2 + $0x18] sm:$0x11] %v791_v4  ;;  %802 = vst [vmem:[#allocation2 + $0x28] sm:$0x11] %v801_v5  ;;  %v37_v29 = vld [vmem:[%s2914_s7 + $0x38] sm:$0xff] }
  0x95   :  { %v435_v15 = vrot.slane %v2463_v37, 5  ;;  %v2521_v18 = vpack.c.bf16 %v33_v13, %v32_v12  ;;  %v2535_v24 = vpack.c.bf16 %v35_v20, %v34_v19  ;;  %v1678_v26 = vrot.slane %v418_v22, 9  ;;  %v38_v36 = vld [vmem:[%s2914_s7 + $0x40] sm:$0xff]  ;;  %v39_v37 = vld [vmem:[%s2914_s7 + $0x48] sm:$0xff]  ;;  %v40_v39 = vld [vmem:[%s2914_s7 + $0x50] sm:$0xff] }
  0x96   :  { %1918 = vmatpush3.bf16.msra.mxu0 %v2251_v44  ;;  %1897 = vmatprep.mubr.msk.bf16.mxu1 %vm262_vm11, %v1659_v2  ;;  %v203_v7 = vrot.slane %v202_v25, 4  ;;  %v213_v8 = vrot.slane %v212_v3, 4  ;;  %v438_v27 = vrot.slane %v2478_v47, 5  ;;  %v490_v31 = vsel %vm269_vm5, %v2255_v21, 0  ;;  %v41_v40 = vld [vmem:[%s2914_s7 + $0x58] sm:$0xff]  ;;  %v42_v42 = vld [vmem:[%s2914_s7 + $0x60] sm:$0xff] }
  0x97   :  { %1919 = vmatprep.subr.bf16.mxu0 %v2253_v1  ;;  %v437_v23 = vrot.slane %v435_v15, 4  ;;  %v2550_v33 = vpack.c.bf16 %v37_v29, %v36_v28  ;;  %v436_v34 = vsel %vm2452_vm9, %v1678_v26, %v435_v15  ;;  %v2564_v38 = vpack.c.bf16 %v39_v37, %v38_v36  ;;  %v43_v44 = vld [vmem:[%s2914_s7 + $0x68] sm:$0xff]  ;;  %v44_v46 = vld [vmem:[%s2914_s7 + $0x70] sm:$0xff]  ;;  %v45_v47 = vld [vmem:[%s2914_s7 + $0x78] sm:$0xff] }
  0x98   :  { %v208_v6 = vsel %vm2482_vm15, %v203_v7, %v207_v60  ;;  %v218_v14 = vsel %vm2482_vm15, %v213_v8, %v217_v9  ;;  %v2577_v43 = vpack.c.bf16 %v41_v40, %v40_v39  ;;  %v2582_v45 = vpack.c.bf16 %v43_v44, %v42_v42  ;;  %v2257_v26 = vld [vmem:[%s2915_s4 + $0x50] sm:$0xff]  }
  0x99   :  { %v1660_v16 = vcombine.low %v208_v6, %v218_v14  ;;  %v439_v32 = vsel %vm2452_vm9, %v437_v23, %v438_v27  ;;  %v2594_v49 = vpack.c.bf16 %v45_v47, %v44_v46  ;;  %v2288_v22 = vmov 0   ;;  %v2256_v23 = vld [vmem:[%s2915_s4 + $0x48] sm:$0xff]  }
  0x9a   :  { %1920 = vmatpush3.bf16.msra.mxu0 %v2253_v1  ;;  %v1689_v35 = vcombine.low %v436_v34, %v439_v32 }
  0x9b   :  { %1898 = vmatmul.mubr.msk.bf16.vlgmr.msra.gmra.mrb[0].mxu1 %vm262_vm11, %v1660_v16  ;;  %1921 = vmatprep.subr.bf16.mxu0 %v2254_v11 }
  0x9c   :  { %2084 = vmatpush3.bf16.msra.mxu1 %v2403_v30 }
  0x9d   :  { %2086 = vmatprep.subr.bf16.mxu1 %v2521_v18 }
  0x9e   :  { %1922 = vmatpush3.bf16.msra.mxu0 %v2254_v11 }
  0x9f   :  { %2235 = vmatprep.subr.msk.bf16.mxu0 %vm269_vm5, %v2255_v21  ;;  %vm1054_vm5 = vcmask 130048  }
  0xa0   :  { %2088 = vmatpush3.bf16.msra.mxu1 %v2521_v18 }
  0xa1   :  { %2090 = vmatprep.subr.bf16.mxu1 %v2535_v24 }
  0xa2   :  { %1924 = vmatpush3.bf16.msra.mxu0 %v490_v31 }
  0xa3   :  { %1061 = vmatprep.subr.bf16.mxu0 %v2288_v22 }
  0xa4   :  { %2092 = vmatpush3.bf16.msra.mxu1 %v2535_v24 }
  0xa5   :  { %1926 = vmatmul.mubr.msk.bf16.vlgmr.msra.gmra.mrb[0].mxu0 %vm262_vm11, %v1689_v35  ;;  %2094 = vmatprep.subr.bf16.mxu1 %v2550_v33  ;;  %vm811_vm11 = vcmask 64512  }
  0xa6   :  { %1062 = vmatpush1.bf16.msra.mxu0 %v2256_v23 }
  0xa7   :  { %1063 = vmatprep.subr.bf16.mxu0 %v2288_v22 }
  0xa8   :  { %2096 = vmatpush3.bf16.msra.mxu1 %v2550_v33 }
  0xa9   :  { %2098 = vmatprep.subr.bf16.mxu1 %v2564_v38 }
  0xaa   :  { %1064 = vmatpush1.bf16.msra.mxu0 %v2257_v26 }
  0xab   :  { %1065 = vmatprep.subr.bf16.mxu0 %v2288_v22 }
  0xac   :  { %2100 = vmatpush3.bf16.msra.mxu1 %v2564_v38 }
  0xad   :  { %2102 = vmatprep.subr.bf16.mxu1 %v2577_v43 }
  0xb0   :  { %2104 = vmatpush3.bf16.msra.mxu1 %v2577_v43 }
  0xb1   :  { %2106 = vmatprep.subr.bf16.mxu1 %v2582_v45 }
  0xb4   :  { %2108 = vmatpush3.bf16.msra.mxu1 %v2582_v45 }
  0xb5   :  { %2110 = vmatprep.subr.bf16.mxu1 %v2594_v49 }
  0xb8   :  { %2112 = vmatpush3.bf16.msra.mxu1 %v2594_v49 }
  0xb9   :  { %2114 = vmatprep.subr.bf16.mxu1 %v2403_v30 }
 0x16e   :  { %v1899_v50 = vpop.f32.mrb[0].mxu1 }
 0x16f   :  { %v307_v51 = vpop.f32.mrb[1].mxu1 }
 0x170   :  { %v1900_v52 = vpop.f32.mrb[2].mxu1 }
 0x171   :  { %v310_v53 = vpop.f32.mrb[3].mxu1 }
 0x178   :  { %v1927_v54 = vpop.f32.mrb[0].mxu0 }
 0x179   :  { %v2209_v55 = vadd.f32 %v1927_v54, %v1899_v50  ;;  %v526_v56 = vpop.f32.mrb[1].mxu0  ;;  %v749_v50 = vlaneseq }
 0x17a   :  { %v2210_v57 = vadd.f32 %v526_v56, %v307_v51  ;;  %v1928_v58 = vpop.f32.mrb[2].mxu0 }
 0x17b   :  { %v2211_v59 = vadd.f32 %v1928_v58, %v1900_v52  ;;  %v529_v60 = vpop.f32.mrb[3].mxu0  ;;  %v2652_v51 = vshrl.u32 %v749_v50, 7  ;;  %v744_v52 = vld [vmem:[%s2916_s2] sm:$0x1] }
 0x17c   :  { %v2212_v61 = vadd.f32 %v529_v60, %v310_v53  ;;  %1961 = vmatprep.mubr.f32.mxu1 %v2210_v57 }
 0x17d   :  { %v751_v53 = vsub.s32 0, %v2652_v51 }
 0x17e   :  { %1962 = vmatmul.mubr.f32.vlgmr.msra.gmra.mrb[4].mxu1 %v2212_v61 }
 0x17f   :  { %1964 = vmatprep.mubr.f32.mxu1 %v2209_v55  ;;  %2116 = vmatpush3.bf16.msra.mxu1 %v2403_v30 }
 0x180   :  { %2118 = vmatprep.subr.bf16.mxu1 %v2521_v18 }
 0x182   :  { %1965 = vmatmul.mubr.f32.gmra.mrb[6].mxu1 %v2211_v59 }
 0x183   :  { %2120 = vmatpush3.bf16.msra.mxu1 %v2521_v18 }
 0x184   :  { %2122 = vmatprep.subr.bf16.mxu1 %v2535_v24 }
 0x187   :  { %2124 = vmatpush3.bf16.msra.mxu1 %v2535_v24 }
 0x188   :  { %2126 = vmatprep.subr.bf16.mxu1 %v2550_v33 }
 0x18b   :  { %2128 = vmatpush3.bf16.msra.mxu1 %v2550_v33 }
 0x18c   :  { %2130 = vmatprep.subr.bf16.mxu1 %v2564_v38 }
 0x18f   :  { %2132 = vmatpush3.bf16.msra.mxu1 %v2564_v38 }
 0x190   :  { %2134 = vmatprep.subr.bf16.mxu1 %v2577_v43 }
 0x193   :  { %2136 = vmatpush3.bf16.msra.mxu1 %v2577_v43 }
 0x194   :  { %2138 = vmatprep.subr.bf16.mxu1 %v2582_v45 }
 0x197   :  { %2140 = vmatpush3.bf16.msra.mxu1 %v2582_v45 }
 0x198   :  { %2142 = vmatprep.subr.bf16.mxu1 %v2594_v49 }
 0x19b   :  { %2144 = vmatpush3.bf16.msra.mxu1 %v2594_v49 }
 0x19c   :  { %2146 = vmatprep.subr.bf16.mxu1 %v2403_v30 }
 0x251   :  { %v1963_v62 = vpop.f32.mrb[4].mxu1 }
 0x252   :  { %v611_v63 = vpop.f32.mrb[5].mxu1 }
 0x253   :  { %v630_v0 = vadd.f32 %v1963_v62, %v611_v63  ;;  %v2258_v62 = vld [vmem:[%s2915_s4 + $0x58] sm:$0xff]  }
 0x254   :  { %1066 = vmatpush1.bf16.msra.mxu0 %v2258_v62 }
 0x255   :  { %v1966_v1 = vpop.f32.mrb[6].mxu1  ;;  %1067 = vmatprep.subr.bf16.mxu0 %v2288_v22 }
 0x256   :  { %v621_v2 = vpop.f32.mrb[7].mxu1 }
 0x257   :  { %v631_v25 = vadd.f32 %v630_v0, %v621_v2 }
 0x259   :  { %v632_v3 = vadd.f32 %v1966_v1, %v631_v25 }
 0x25b   :  { %v633_v4 = vrot.slane %v632_v3, 4 }
 0x25d   :  { %v634_v5 = vadd.f32 %v633_v4, %v632_v3 }
 0x25f   :  { %v635_v7 = vrot.slane %v634_v5, 2 }
 0x261   :  { %v636_v8 = vadd.f32 %v635_v7, %v634_v5 }
 0x263   :  { %v637_v9 = vrot.slane %v636_v8, 1 }
 0x265   :  { %v638_v12 = vadd.f32 %v637_v9, %v636_v8  ;;  %v2259_v9 = vld [vmem:[%s2915_s4 + $0x60] sm:$0xff]  }
 0x266   :  { %1068 = vmatpush1.bf16.msra.mxu0 %v2259_v9 }
 0x267   :  { %v640_v13 = vmul.f32 0.03125, %v638_v12  ;;  %1069 = vmatprep.subr.bf16.mxu0 %v2288_v22 }
 0x269   :  { %v2615_v11 = vsub.f32 %v2210_v57, %v640_v13  ;;  %v2617_v6 = vsub.f32 %v2212_v61, %v640_v13  ;;  %v2619_v14 = vsub.f32 %v2209_v55, %v640_v13  ;;  %v644_v19 = vsub.f32 %v2211_v59, %v640_v13  ;;  %v1697_v57 = vld [vmem:[%s2917_s3] ss:$0 sm:$0xff] }
 0x26b   :  { %v645_v15 = vmul.f32 %v2615_v11, %v2615_v11  ;;  %v646_v16 = vmul.f32 %v2617_v6, %v2617_v6  ;;  %v647_v20 = vmul.f32 %v2619_v14, %v2619_v14  ;;  %v648_v21 = vmul.f32 %v644_v19, %v644_v19 }
 0x26d   :  { %1999 = vmatprep.mubr.f32.mxu1 %v645_v15  ;;  %v2261_v15 = vld [vmem:[%s2915_s4 + $0x70] sm:$0xff]  }
 0x26e   :  { %2000 = vmatmul.mubr.f32.vlgmr.msra.gmra.mrb[8].mxu1 %v646_v16  ;;  %v2262_v16 = vld [vmem:[%s2915_s4 + $0x78] sm:$0xff]  }
 0x26f   :  { %2002 = vmatprep.mubr.f32.mxu1 %v647_v20  ;;  %2148 = vmatpush3.bf16.msra.mxu1 %v2403_v30  ;;  %v2264_v20 = vld [vmem:[%s2915_s4 + $0x88] sm:$0xff]  }
 0x270   :  { %2150 = vmatprep.subr.bf16.mxu1 %v2521_v18 }
 0x272   :  { %2003 = vmatmul.mubr.f32.gmra.mrb[10].mxu1 %v648_v21 }
 0x273   :  { %2152 = vmatpush3.bf16.msra.mxu1 %v2521_v18 }
 0x274   :  { %2154 = vmatprep.subr.bf16.mxu1 %v2535_v24 }
 0x277   :  { %2156 = vmatpush3.bf16.msra.mxu1 %v2535_v24 }
 0x278   :  { %2158 = vmatprep.subr.bf16.mxu1 %v2550_v33 }
 0x27b   :  { %2160 = vmatpush3.bf16.msra.mxu1 %v2550_v33 }
 0x27c   :  { %2162 = vmatprep.subr.bf16.mxu1 %v2564_v38 }
 0x27f   :  { %2164 = vmatpush3.bf16.msra.mxu1 %v2564_v38 }
 0x280   :  { %2166 = vmatprep.subr.bf16.mxu1 %v2577_v43 }
 0x283   :  { %2168 = vmatpush3.bf16.msra.mxu1 %v2577_v43 }
 0x284   :  { %2170 = vmatprep.subr.bf16.mxu1 %v2582_v45 }
 0x287   :  { %2172 = vmatpush3.bf16.msra.mxu1 %v2582_v45 }
 0x288   :  { %2174 = vmatprep.subr.bf16.mxu1 %v2594_v49 }
 0x28b   :  { %2176 = vmatpush3.bf16.msra.mxu1 %v2594_v49 }
 0x28c   :  { %2178 = vmatprep.subr.bf16.mxu1 %v2403_v30 }
 0x341   :  { %v2001_v27 = vpop.f32.mrb[8].mxu1 }
 0x342   :  { %v715_v28 = vpop.f32.mrb[9].mxu1 }
 0x343   :  { %v734_v29 = vadd.f32 %v2001_v27, %v715_v28 }
 0x345   :  { %v2004_v31 = vpop.f32.mrb[10].mxu1 }
 0x346   :  { %v725_v32 = vpop.f32.mrb[11].mxu1 }
 0x347   :  { %v735_v34 = vadd.f32 %v734_v29, %v725_v32 }
 0x349   :  { %v736_v35 = vadd.f32 %v2004_v31, %v735_v34 }
 0x34b   :  { %v737_v36 = vrot.slane %v736_v35, 4 }
 0x34d   :  { %v738_v37 = vadd.f32 %v737_v36, %v736_v35 }
 0x34f   :  { %v739_v39 = vrot.slane %v738_v37, 2 }
 0x351   :  { %v740_v40 = vadd.f32 %v739_v39, %v738_v37 }
 0x353   :  { %v741_v42 = vrot.slane %v740_v40, 1 }
 0x355   :  { %v742_v44 = vadd.f32 %v741_v42, %v740_v40 }
 0x357   :  { %v743_v46 = vmul.f32 0.03125, %v742_v44 }
 0x359   :  { %v745_v47 = vadd.f32 1e-05, %v743_v46 }
 0x35b   :  { %2283 = vrsqrt.f32 %v745_v47 }
 0x365   :  { %v2284_v54 = vpop.eup %2283 }
 0x366   :  { %v747_v55 = vmul.f32 %v2284_v54, %v744_v52 }
 0x368   :  { %v752_v56 = vrot.slane %v747_v55, %v751_v53 }
 0x36a   :  { %v754_v58 = vmul.f32 %v752_v56, %v2615_v11  ;;  %v755_v59 = vmul.f32 %v752_v56, %v2617_v6  ;;  %v756_v60 = vmul.f32 %v752_v56, %v2619_v14  ;;  %v757_v61 = vmul.f32 %v752_v56, %v644_v19  ;;  %v2260_v6 = vld [vmem:[%s2915_s4 + $0x68] sm:$0xff]   ;;  %v2263_v19 = vld [vmem:[%s2915_s4 + $0x80] sm:$0xff]  }
 0x36b   :  { %1070 = vmatpush1.bf16.msra.mxu0 %v2260_v6 }
 0x36c   :  { %v765_v63 = vadd.f32 %v1697_v57, %v754_v58  ;;  %v766_v0 = vadd.f32 %v1697_v57, %v755_v59  ;;  %v767_v1 = vadd.f32 %v1697_v57, %v756_v60  ;;  %v768_v2 = vadd.f32 %v1697_v57, %v757_v61  ;;  %1071 = vmatprep.subr.bf16.mxu0 %v2288_v22  ;;  %v879_v57 = vld [vmem:[#allocation2] sm:$0xff]  ;;  %v885_v58 = vld [vmem:[#allocation2 + $0x10] sm:$0x11] }
 0x36e   :  { %vm769_vm0 = vcmp.gt.f32.partialorder %v765_v63, 0.0  ;;  %vm770_vm1 = vcmp.gt.f32.partialorder %v766_v0, 0.0  ;;  %v773_v25 = vmul.f32 0.2, %v765_v63  ;;  %v774_v3 = vmul.f32 0.2, %v766_v0 }
 0x36f   :  { %vm771_vm7 = vcmp.gt.f32.partialorder %v767_v1, 0.0  ;;  %vm772_vm8 = vcmp.gt.f32.partialorder %v768_v2, 0.0  ;;  %v775_v4 = vmul.f32 0.2, %v767_v1  ;;  %v776_v5 = vmul.f32 0.2, %v768_v2  ;;  %1072 = vmatpush1.bf16.msra.mxu0 %v2261_v15 }
 0x370   :  { %v777_v7 = vsel %vm769_vm0, %v765_v63, %v773_v25  ;;  %v778_v8 = vsel %vm770_vm1, %v766_v0, %v774_v3  ;;  %1073 = vmatprep.subr.bf16.mxu0 %v2288_v22 }
 0x371   :  { %v803_v12 = vpack.c.bf16 %v778_v8, %v777_v7  ;;  %v779_v13 = vsel %vm771_vm7, %v767_v1, %v775_v4  ;;  %v780_v11 = vsel %vm772_vm8, %v768_v2, %v776_v5 }
 0x372   :  { %v804_v14 = vpack.c.bf16 %v780_v11, %v779_v13  ;;  %v892_v13 = vld [vmem:[#allocation2 + $0x28] sm:$0x11] }
 0x373   :  { %807 = vrot.lane.b32.xlu1 %v803_v12, %s2289_s0  ;;  %1074 = vmatpush1.bf16.msra.mxu0 %v2262_v16  ;;  %v888_v12 = vld [vmem:[#allocation2 + $0x18] sm:$0xff] }
 0x374   :  { %1075 = vmatprep.subr.bf16.mxu0 %v2288_v22 }
 0x377   :  { %809 = vrot.lane.b32.xlu1 %v804_v14, %s2289_s0  ;;  %1076 = vmatpush1.bf16.msra.mxu0 %v2263_v19 }
 0x378   :  { %1077 = vmatprep.subr.bf16.mxu0 %v2288_v22 }
 0x37b   :  { %1078 = vmatpush1.bf16.msra.mxu0 %v2264_v20 }
 0x37c   :  { %1188 = vmatprep.subr.bf16.mxu0 %v2288_v22 }
 0x3e5   :  { %v808_v21 = vpop.permute.xlu1 %807 }
 0x3e6   :  { %v813_v23 = vsel %vm811_vm11, 0, %v808_v21  ;;  %v816_v26 = vsel %vm811_vm11, %v808_v21, 0 }
 0x3e7   :  { %v1698_v27 = vcombine.low %v813_v23, %v816_v26  ;;  %v1699_v28 = vcombine.high %v813_v23, %v816_v26 }
 0x3e9   :  { %v835_v32 = vshrl.u32 %v1698_v27, 16  ;;  %v843_v34 = vshrl.u32 %v1699_v28, 16  ;;  %v810_v35 = vpop.permute.xlu1 %809  ;;  %v838_v36 = vshll.u32 %v1698_v27, 16  ;;  %v846_v37 = vshll.u32 %v1699_v28, 16 }
 0x3ea   :  { %v815_v39 = vsel %vm811_vm11, 0, %v810_v35  ;;  %v817_v40 = vsel %vm811_vm11, %v810_v35, 0 }
 0x3eb   :  { %v837_v42 = vrot.slane %v835_v32, 7  ;;  %v845_v44 = vrot.slane %v843_v34, 7  ;;  %v1700_v46 = vcombine.low %v815_v39, %v817_v40  ;;  %v1701_v47 = vcombine.high %v815_v39, %v817_v40 }
 0x3ed   :  { %v840_v52 = vor.u32 %v838_v36, %v837_v42  ;;  %v841_v54 = vrot.slane %v837_v42, 4  ;;  %v848_v55 = vor.u32 %v846_v37, %v845_v44  ;;  %v850_v56 = vrot.slane %v845_v44, 4 }
 0x3ee   :  { %v852_v59 = vshrl.u32 %v1700_v46, 16  ;;  %v860_v60 = vshrl.u32 %v1701_v47, 16  ;;  %v855_v1 = vshll.u32 %v1700_v46, 16  ;;  %v863_v25 = vshll.u32 %v1701_v47, 16 }
 0x3ef   :  { %v849_v61 = vsel %vm2408_vm10, %v841_v54, %v848_v55  ;;  %v2723_v62 = vsel %vm878_vm2, %v840_v52, %v879_v57  ;;  %v886_v63 = vsel %vm2435_vm6, %v850_v56, %v885_v58 }
 0x3f0   :  { %881 = vst [vmem:[#allocation2] sm:$0xff] %v2723_v62  ;;  %884 = vst.msk [vmem:[#allocation2 + $0x8] sm:$0xff] %vm2712_vm4, %v849_v61  ;;  %v854_v0 = vrot.slane %v852_v59, 7  ;;  %v862_v2 = vrot.slane %v860_v60, 7  ;;  %v920_v3 = vshrl.u32 %v2723_v62, 16  ;;  %v923_v4 = vshll.u32 %v2723_v62, 16 }
 0x3f1   :  { %887 = vst [vmem:[#allocation2 + $0x10] sm:$0x11] %v886_v63  ;;  %v2265_v61 = vld [vmem:[%s2915_s4] sm:$0xff]  }
 0x3f2   :  { %v857_v5 = vor.u32 %v855_v1, %v854_v0  ;;  %v858_v7 = vrot.slane %v854_v0, 4  ;;  %v865_v8 = vor.u32 %v863_v25, %v862_v2  ;;  %v867_v9 = vrot.slane %v862_v2, 4 }
 0x3f3   :  { %v922_v15 = vrot.slane %v920_v3, 4  ;;  %v925_v16 = vrot.slane %v923_v4, 5 }
 0x3f4   :  { %v866_v11 = vsel %vm2408_vm10, %v858_v7, %v865_v8  ;;  %v2739_v6 = vsel %vm878_vm2, %v857_v5, %v888_v12  ;;  %v893_v14 = vsel %vm2435_vm6, %v867_v9, %v892_v13  ;;  %v2266_v9 = vld [vmem:[%s2915_s4 + $0x8] sm:$0xff]  }
 0x3f5   :  { %890 = vst [vmem:[#allocation2 + $0x18] sm:$0xff] %v2739_v6  ;;  %891 = vst.msk [vmem:[#allocation2 + $0x20] sm:$0xff] %vm2712_vm4, %v866_v11  ;;  %v944_v20 = vshrl.u32 %v2739_v6, 16  ;;  %v947_v21 = vshll.u32 %v2739_v6, 16  ;;  %v926_v26 = vor.u32 %v925_v16, %v922_v15  ;;  %v2268_v16 = vld [vmem:[%s2915_s4 + $0x18] sm:$0xff]  }
 0x3f6   :  { %894 = vst [vmem:[#allocation2 + $0x28] sm:$0x11] %v893_v14 }
 0x3f7   :  { %v2746_v41 = vld [vmem:[#allocation2 + $0x8] sm:$0xff]  ;;  %v946_v31 = vrot.slane %v944_v20, 4  ;;  %v949_v32 = vrot.slane %v947_v21, 5  ;;  %v927_v42 = vrot.slane %v926_v26, 4  ;;  %v2269_v20 = vld [vmem:[%s2915_s4 + $0x20] sm:$0xff]  }
 0x3f8   :  { %v2748_v19 = vld [vmem:[#allocation2 + $0x10] sm:$0x11]  ;;  %v929_v23 = vshll.u32 %v2746_v41, 16  ;;  %v933_v10 = vshrl.u32 %v2746_v41, 16  ;;  %v1736_v15 = vcombine.high %v2723_v62, %v2746_v41  ;;  %v2270_v21 = vld [vmem:[%s2915_s4 + $0x28] sm:$0xff]   ;;  %v2273_v26 = vld [vmem:[%s2915_s4 + $0x40] sm:$0xff]  }
 0x3f9   :  { %v939_v29 = vshll.u32 %v2748_v19, 16  ;;  %v950_v47 = vor.u32 %v949_v32, %v946_v31  ;;  %v1237_v32 = vld [vmem:[#allocation2] sm:$0xee] }
 0x3fa   :  { %v931_v27 = vrot.slane %v929_v23, 5  ;;  %v935_v28 = vrot.slane %v933_v10, 4  ;;  %v2271_v23 = vld [vmem:[%s2915_s4 + $0x30] sm:$0xff]   ;;  %v2272_v10 = vld [vmem:[%s2915_s4 + $0x38] sm:$0xff]  }
 0x3fb   :  { %v941_v46 = vrot.slane %v939_v29, 5  ;;  %v951_v2 = vrot.slane %v950_v47, 4  ;;  %v1735_v29 = vcombine.low %v2723_v62, %v2746_v41  ;;  %v1248_v62 = vrot.slane %v2748_v19, 5  ;;  %v2277_v19 = vld [vmem:[%s2915_s4 + $0xa8] sm:$0xff]   ;;  %v2282_v47 = vld [vmem:[%s2915_s4 + $0xd0] sm:$0xff]  }
 0x3fc   :  { %v936_v34 = vor.u32 %v935_v28, %v931_v27  ;;  %v2755_v35 = vld [vmem:[#allocation2 + $0x20] sm:$0xff]  ;;  %v1238_v40 = vld [vmem:[#allocation2 + $0x18] sm:$0xee]  ;;  %v932_v55 = vsel %vm2482_vm15, %v927_v42, %v931_v27  ;;  %v1245_v27 = vrot.slane %v2746_v41, 5  ;;  %v2274_v28 = vld [vmem:[%s2915_s4 + $0x90] sm:$0xff]  }
 0x3fd   :  { %v918_v36 = vld [vmem:[#allocation2 + $0x28] sm:$0x11]  ;;  %v953_v37 = vshll.u32 %v2755_v35, 16  ;;  %v957_v39 = vshrl.u32 %v2755_v35, 16  ;;  %v1751_v57 = vrot.slane %v1238_v40, 9  ;;  %v1252_v58 = vrot.slane %v2755_v35, 5 }
 0x3fe   :  { %v937_v44 = vrot.slane %v936_v34, 4  ;;  %v963_v54 = vshll.u32 %v918_v36, 16  ;;  %v1255_v1 = vrot.slane %v918_v36, 5  ;;  %v1738_v31 = vcombine.high %v2739_v6, %v2755_v35  ;;  %v2275_v36 = vld [vmem:[%s2915_s4 + $0x98] sm:$0xff]  }
 0x3ff   :  { %v955_v50 = vrot.slane %v953_v37, 5  ;;  %v959_v52 = vrot.slane %v957_v39, 4  ;;  %v1254_v0 = vrot.slane %v1252_v58, 4  ;;  %v2770_v4 = vsel %vm2452_vm9, %v1751_v57, %v1252_v58  ;;  %v2276_v39 = vld [vmem:[%s2915_s4 + $0xa0] sm:$0xff]  }
 0x400   :  { %v942_v56 = vsel %vm2482_vm15, %v937_v44, %v941_v46  ;;  %v965_v3 = vrot.slane %v963_v54, 5  ;;  %v1247_v34 = vrot.slane %v1245_v27, 4  ;;  %v1750_v37 = vrot.slane %v1237_v32, 9  ;;  %v2281_v46 = vld [vmem:[%s2915_s4 + $0xc8] sm:$0xff]   ;;  %v1601_v32 = vld [vmem:[%s2918_s5] sm:$0x1] }
 0x401   :  { %v1721_v59 = vcombine.high %v932_v55, %v942_v56  ;;  %v1720_v60 = vcombine.low %v932_v55, %v942_v56  ;;  %v960_v63 = vor.u32 %v959_v52, %v955_v50  ;;  %v2774_v5 = vsel %vm2452_vm9, %v1254_v0, %v1255_v1 }
 0x402   :  { %v956_v7 = vsel %vm2482_vm15, %v951_v2, %v955_v50  ;;  %v1773_v12 = vcombine.high %v2770_v4, %v2774_v5  ;;  %v1772_v13 = vcombine.low %v2770_v4, %v2774_v5  ;;  %v1249_v41 = vsel %vm2452_vm9, %v1247_v34, %v1248_v62  ;;  %v1785_v62 = vld [vmem:[%s2919_s6] ss:$0 sm:$0xff] }
 0x403   :  { %1733 = vmatprep.mubr.msk.bf16.mxu0 %vm1054_vm5, %v1721_v59  ;;  %v961_v25 = vrot.slane %v960_v63, 4  ;;  %v1737_v40 = vcombine.low %v2739_v6, %v2755_v35  ;;  %v1246_v42 = vsel %vm2452_vm9, %v1750_v37, %v1245_v27  ;;  %v2278_v6 = vld [vmem:[%s2915_s4 + $0xb0] sm:$0xff]   ;;  %v2280_v35 = vld [vmem:[%s2915_s4 + $0xc0] sm:$0xff]  }
 0x404   :  { %1094 = vmatmul.mubr.bf16.vlgmr.msra.gmra.mrb[4].mxu0 %v1720_v60  ;;  %v1771_v44 = vcombine.high %v1246_v42, %v1249_v41  ;;  %v1770_v50 = vcombine.low %v1246_v42, %v1249_v41 }
 0x405   :  { %1189 = vmatpush1.bf16.msra.mxu0 %v2265_v61  ;;  %v966_v8 = vsel %vm2482_vm15, %v961_v25, %v965_v3 }
 0x406   :  { %v1723_v11 = vcombine.high %v956_v7, %v966_v8  ;;  %1190 = vmatprep.subr.bf16.mxu0 %v2288_v22  ;;  %v1722_v14 = vcombine.low %v956_v7, %v966_v8 }
 0x408   :  { %1734 = vmatprep.mubr.msk.bf16.mxu0 %vm1054_vm5, %v1723_v11 }
 0x409   :  { %1191 = vmatpush1.bf16.msra.mxu0 %v2266_v9 }
 0x40a   :  { %1192 = vmatprep.subr.bf16.mxu0 %v2288_v22 }
 0x40c   :  { %1102 = vmatmul.mubr.bf16.gmra.mrb[8].mxu0 %v1722_v14 }
 0x40d   :  { %1193 = vmatpush1.bf16.msra.mxu0 %v2267_v48  ;;  %1748 = vmatprep.mubr.msk.bf16.mxu0 %vm1054_vm5, %v1736_v15 }
 0x40e   :  { %1194 = vmatprep.subr.bf16.mxu0 %v2288_v22 }
 0x411   :  { %1195 = vmatpush1.bf16.msra.mxu0 %v2268_v16 }
 0x412   :  { %1196 = vmatprep.subr.bf16.mxu0 %v2288_v22 }
 0x415   :  { %1197 = vmatpush1.bf16.msra.mxu0 %v2269_v20 }
 0x416   :  { %1198 = vmatprep.subr.bf16.mxu0 %v2288_v22 }
 0x419   :  { %1199 = vmatpush1.bf16.msra.mxu0 %v2270_v21 }
 0x41a   :  { %1200 = vmatprep.subr.bf16.mxu0 %v2288_v22 }
 0x41d   :  { %1201 = vmatpush1.bf16.msra.mxu0 %v2271_v23 }
 0x41e   :  { %1202 = vmatprep.subr.bf16.mxu0 %v2288_v22 }
 0x421   :  { %1203 = vmatpush1.bf16.msra.mxu0 %v2272_v10 }
 0x422   :  { %1204 = vmatprep.subr.bf16.mxu0 %v2288_v22 }
 0x425   :  { %1205 = vmatpush1.bf16.msra.mxu0 %v2273_v26 }
 0x426   :  { %1350 = vmatprep.subr.bf16.mxu0 %v2288_v22 }
 0x428   :  { %1221 = vmatmul.mubr.bf16.vlgmr.msra.gmra.mrb[4].mxu0 %v1735_v29 }
 0x429   :  { %1749 = vmatprep.mubr.msk.bf16.mxu0 %vm1054_vm5, %v1738_v31  ;;  %1351 = vmatpush1.bf16.msra.mxu0 %v2274_v28 }
 0x42a   :  { %1352 = vmatprep.subr.bf16.mxu0 %v2288_v22 }
 0x42d   :  { %1353 = vmatpush1.bf16.msra.mxu0 %v2275_v36 }
 0x42e   :  { %1354 = vmatprep.subr.bf16.mxu0 %v2288_v22 }
 0x430   :  { %1229 = vmatmul.mubr.bf16.gmra.mrb[8].mxu0 %v1737_v40 }
 0x431   :  { %1355 = vmatpush1.bf16.msra.mxu0 %v2276_v39  ;;  %1783 = vmatprep.mubr.msk.bf16.mxu0 %vm1054_vm5, %v1771_v44 }
 0x432   :  { %1356 = vmatprep.subr.bf16.mxu0 %v2288_v22 }
 0x435   :  { %1357 = vmatpush1.bf16.msra.mxu0 %v2277_v19 }
 0x436   :  { %1358 = vmatprep.subr.bf16.mxu0 %v2288_v22 }
 0x439   :  { %1359 = vmatpush1.bf16.msra.mxu0 %v2278_v6 }
 0x43a   :  { %1360 = vmatprep.subr.bf16.mxu0 %v2288_v22 }
 0x43d   :  { %1361 = vmatpush1.bf16.msra.mxu0 %v2279_v17 }
 0x43e   :  { %1362 = vmatprep.subr.bf16.mxu0 %v2288_v22 }
 0x441   :  { %1363 = vmatpush1.bf16.msra.mxu0 %v2280_v35 }
 0x442   :  { %1364 = vmatprep.subr.bf16.mxu0 %v2288_v22 }
 0x445   :  { %1365 = vmatpush1.bf16.msra.mxu0 %v2281_v46 }
 0x446   :  { %1366 = vmatprep.subr.bf16.mxu0 %v2288_v22 }
 0x449   :  { %1367 = vmatpush1.bf16.msra.mxu0 %v2282_v47 }
 0x44c   :  { %1383 = vmatmul.mubr.bf16.vlgmr.msra.gmra.mrb[4].mxu0 %v1770_v50 }
 0x44d   :  { %1784 = vmatprep.mubr.msk.bf16.mxu0 %vm1054_vm5, %v1773_v12 }
 0x454   :  { %1391 = vmatmul.mubr.bf16.gmra.mrb[8].mxu0 %v1772_v13 }
 0x51f   :  { %v1384_v52 = vpop.f32.mrb[4].mxu0 }
 0x520   :  { %v1386_v54 = vpop.f32.mrb[5].mxu0  ;;  %2037 = vmatprep.mubr.f32.mxu1 %v1384_v52 }
 0x521   :  { %v1387_v55 = vpop.f32.mrb[6].mxu0 }
 0x522   :  { %v1389_v56 = vpop.f32.mrb[7].mxu0  ;;  %2038 = vmatmul.mubr.f32.vlgmr.msra.gmra.mrb[12].mxu1 %v1387_v55 }
 0x523   :  { %2180 = vmatpush3.bf16.msra.mxu1 %v2403_v30 }
 0x524   :  { %2182 = vmatprep.subr.bf16.mxu1 %v2521_v18 }
 0x527   :  { %v1392_v22 = vpop.f32.mrb[8].mxu0  ;;  %2184 = vmatpush3.bf16.msra.mxu1 %v2521_v18 }
 0x528   :  { %v1394_v57 = vpop.f32.mrb[9].mxu0  ;;  %2040 = vmatprep.mubr.f32.mxu1 %v1392_v22  ;;  %2186 = vmatprep.subr.bf16.mxu1 %v2535_v24 }
 0x529   :  { %v1395_v58 = vpop.f32.mrb[10].mxu0 }
 0x52a   :  { %v1397_v59 = vpop.f32.mrb[11].mxu0  ;;  %2041 = vmatmul.mubr.f32.gmra.mrb[14].mxu1 %v1395_v58 }
 0x52b   :  { %2188 = vmatpush3.bf16.msra.mxu1 %v2535_v24 }
 0x52c   :  { %2190 = vmatprep.subr.bf16.mxu1 %v2550_v33 }
 0x52f   :  { %2192 = vmatpush3.bf16.msra.mxu1 %v2550_v33 }
 0x530   :  { %2194 = vmatprep.subr.bf16.mxu1 %v2564_v38 }
 0x533   :  { %2196 = vmatpush3.bf16.msra.mxu1 %v2564_v38 }
 0x534   :  { %2198 = vmatprep.subr.bf16.mxu1 %v2577_v43 }
 0x537   :  { %2200 = vmatpush3.bf16.msra.mxu1 %v2577_v43 }
 0x538   :  { %2202 = vmatprep.subr.bf16.mxu1 %v2582_v45 }
 0x53b   :  { %2204 = vmatpush3.bf16.msra.mxu1 %v2582_v45 }
 0x53c   :  { %2206 = vmatprep.subr.bf16.mxu1 %v2594_v49 }
 0x53f   :  { %2208 = vmatpush3.bf16.msra.mxu1 %v2594_v49 }
 0x5f5   :  { %v2039_v30 = vpop.f32.mrb[12].mxu1 }
 0x5f6   :  { %v1469_v18 = vpop.f32.mrb[13].mxu1 }
 0x5f7   :  { %v1488_v24 = vadd.f32 %v2039_v30, %v1469_v18 }
 0x5fd   :  { %v2042_v33 = vpop.f32.mrb[14].mxu1 }
 0x5fe   :  { %v1479_v60 = vpop.f32.mrb[15].mxu1 }
 0x5ff   :  { %v1489_v61 = vadd.f32 %v1488_v24, %v1479_v60 }
 0x601   :  { %v1490_v63 = vadd.f32 %v2042_v33, %v1489_v61 }
 0x603   :  { %v1491_v38 = vrot.slane %v1490_v63, 4 }
 0x605   :  { %v1492_v0 = vadd.f32 %v1491_v38, %v1490_v63 }
 0x607   :  { %v1493_v1 = vrot.slane %v1492_v0, 2 }
 0x609   :  { %v1494_v2 = vadd.f32 %v1493_v1, %v1492_v0 }
 0x60b   :  { %v1495_v43 = vrot.slane %v1494_v2, 1 }
 0x60d   :  { %v1496_v25 = vadd.f32 %v1495_v43, %v1494_v2 }
 0x60f   :  { %v1497_v3 = vmul.f32 0.03125, %v1496_v25 }
 0x611   :  { %v1498_v4 = vsub.f32 %v1384_v52, %v1497_v3  ;;  %v1499_v45 = vsub.f32 %v1387_v55, %v1497_v3  ;;  %v1500_v5 = vsub.f32 %v1392_v22, %v1497_v3  ;;  %v1501_v7 = vsub.f32 %v1395_v58, %v1497_v3 }
 0x613   :  { %v1502_v8 = vmul.f32 %v1498_v4, %v1498_v4  ;;  %v1503_v49 = vmul.f32 %v1499_v45, %v1499_v45  ;;  %v1504_v9 = vmul.f32 %v1500_v5, %v1500_v5  ;;  %v1505_v12 = vmul.f32 %v1501_v7, %v1501_v7 }
 0x615   :  { %2075 = vmatprep.mubr.f32.mxu1 %v1502_v8 }
 0x616   :  { %2076 = vmatmul.mubr.f32.vlgmr.msra.gmra.mrb[16].mxu1 %v1503_v49 }
 0x617   :  { %2078 = vmatprep.mubr.f32.mxu1 %v1504_v9 }
 0x61a   :  { %2079 = vmatmul.mubr.f32.gmra.mrb[18].mxu1 %v1505_v12 }
 0x6e9   :  { %v2077_v13 = vpop.f32.mrb[16].mxu1 }
 0x6ea   :  { %v1572_v11 = vpop.f32.mrb[17].mxu1 }
 0x6eb   :  { %v1591_v48 = vadd.f32 %v2077_v13, %v1572_v11 }
 0x6ed   :  { %v2080_v14 = vpop.f32.mrb[18].mxu1 }
 0x6ee   :  { %v1582_v15 = vpop.f32.mrb[19].mxu1 }
 0x6ef   :  { %v1592_v16 = vadd.f32 %v1591_v48, %v1582_v15 }
 0x6f1   :  { %v1593_v20 = vadd.f32 %v2080_v14, %v1592_v16 }
 0x6f3   :  { %v1594_v21 = vrot.slane %v1593_v20, 4 }
 0x6f5   :  { %v1595_v23 = vadd.f32 %v1594_v21, %v1593_v20 }
 0x6f7   :  { %v1596_v10 = vrot.slane %v1595_v23, 2 }
 0x6f9   :  { %v1597_v26 = vadd.f32 %v1596_v10, %v1595_v23 }
 0x6fb   :  { %v1598_v27 = vrot.slane %v1597_v26, 1 }
 0x6fd   :  { %v1599_v28 = vadd.f32 %v1598_v27, %v1597_v26 }
 0x6ff   :  { %v1600_v29 = vmul.f32 0.03125, %v1599_v28 }
 0x701   :  { %v1602_v31 = vadd.f32 1e-05, %v1600_v29 }
 0x703   :  { %2285 = vrsqrt.f32 %v1602_v31 }
 0x70d   :  { %v2286_v34 = vpop.eup %2285 }
 0x70e   :  { %v1604_v36 = vmul.f32 %v2286_v34, %v1601_v32 }
 0x710   :  { %v1609_v37 = vrot.slane %v1604_v36, %v751_v53 }
 0x712   :  { %v1611_v41 = vmul.f32 %v1609_v37, %v1498_v4  ;;  %v1612_v39 = vmul.f32 %v1609_v37, %v1499_v45  ;;  %v1613_v40 = vmul.f32 %v1609_v37, %v1500_v5  ;;  %v1614_v42 = vmul.f32 %v1609_v37, %v1501_v7 }
 0x714   :  { %v1622_v44 = vadd.f32 %v1785_v62, %v1611_v41  ;;  %v1623_v19 = vadd.f32 %v1785_v62, %v1612_v39  ;;  %v1624_v6 = vadd.f32 %v1785_v62, %v1613_v40  ;;  %v1625_v17 = vadd.f32 %v1785_v62, %v1614_v42 }
 0x716   :  { %vm1626_vm10 = vcmp.gt.f32.partialorder %v1622_v44, 0.0  ;;  %vm1627_vm6 = vcmp.gt.f32.partialorder %v1623_v19, 0.0  ;;  %vm1628_vm9 = vcmp.gt.f32.partialorder %v1624_v6, 0.0  ;;  %vm1629_vm13 = vcmp.gt.f32.partialorder %v1625_v17, 0.0 }
 0x717   :  { %v1630_v35 = vmul.f32 0.2, %v1622_v44  ;;  %v1631_v46 = vmul.f32 0.2, %v1623_v19  ;;  %v1632_v51 = vmul.f32 0.2, %v1624_v6 }
 0x718   :  { %v1633_v53 = vmul.f32 0.2, %v1625_v17 }
 0x719   :  { %v1634_v47 = vsel %vm1626_vm10, %v1622_v44, %v1630_v35  ;;  %v1635_v50 = vsel %vm1627_vm6, %v1623_v19, %v1631_v46  ;;  %v1636_v52 = vsel %vm1628_vm9, %v1624_v6, %v1632_v51 }
 0x71a   :  { %v1637_v54 = vsel %vm1629_vm13, %v1625_v17, %v1633_v53  ;;  %1638 = vst [vmem:[%s2920_s8] sm:$0xff] %v1634_v47  ;;  %1639 = vst [vmem:[%s2920_s8 + $0x8] sm:$0xff] %v1635_v50 }
 0x71b   :  { %1640 = vst [vmem:[%s2920_s8 + $0x10] sm:$0xff] %v1636_v52  ;;  %1641 = vst [vmem:[%s2920_s8 + $0x18] sm:$0xff] %v1637_v54 }

</bundles_post_ra>
